<compile_context>
chip_gen: v7x
topology: tpu7x:2x2x1
jax: 0.10.0
libtpu: 0.0.40
codegen_flags: <defaults>
</compile_context>

<pallas_src>
import functools
import math

import jax
import jax.numpy as jnp
from jax import lax
from jax.experimental import pallas as pl
from jax.experimental.pallas import tpu as pltpu

_EPS = 1e-5  # nn.GroupNorm default eps


# --------------------------------------------------------------------------
# Hardware queries (wrapped defensively; fall back to conservative defaults).
# --------------------------------------------------------------------------
def _vmem_budget_bytes():
    # Leave ~25% headroom below physical VMEM for compiler-internal scratch
    # and the output double buffer (48 MiB on v7x's 64 MiB; 96 MiB on
    # v5e/v6e's 128 MiB).
    try:
        cap = int(pltpu.get_tpu_info().vmem_capacity_bytes)
    except Exception:
        cap = 64 << 20  # conservative: assume v7x per-TC capacity
    return (cap * 3) // 4


def _has_bf16_valu():
    # v5e and older have no bf16 VALU; keep the normalize FMA in f32 there.
    try:
        kind = jax.devices()[0].device_kind.lower()
    except Exception:
        return True
    return not any(t in kind for t in ("v2", "v3", "v4", "v5 lite", "v5lite", "v5e"))


def _pick_compute_dtype(x_dtype):
    if jnp.dtype(x_dtype) == jnp.dtype(jnp.bfloat16) and _has_bf16_valu():
        return jnp.bfloat16
    return jnp.float32


# --------------------------------------------------------------------------
# Layout selection: zero-copy reshapes only (no pad, no slice).
# --------------------------------------------------------------------------
def _choose_layout(C, H, W):
    """Returns (rows, lanes, rep): x (C,H,W) -> (rows, lanes), weight repeated
    `rep` times per channel along the row axis."""
    HW = H * W
    R = 8 // math.gcd(C, 8)  # minimal fold with C*R % 8 == 0
    if HW % (R * 128) == 0:
        return C * R, HW // R, R            # dense: rows%8==0, lanes%128==0
    if (C * H) % 8 == 0 and W % 128 == 0:
        return C * H, W, H                  # dense: fold H into rows
    # TODO(synk): ragged fallback keeps rows=C (<8 possible) and an unaligned
    # lane count; block == full array dims so Mosaic masks the tail in-kernel
    # (no extra HBM pad/slice pass).  Typical DDPM shapes take a dense branch.
    return C, HW, 1


def _pick_chunk_lanes(L, rows, itemsize, max_chunk_bytes):
    # L is a multiple of 128 here.  Pick the largest Lc = 128*m with m | (L//128)
    # and rows * Lc * itemsize <= max_chunk_bytes (fall back to 128).
    units = L // 128
    best_m = 1
    for m in range(1, units + 1):
        if units % m == 0 and rows * 128 * m * itemsize <= max_chunk_bytes:
            best_m = m
    return 128 * best_m


# --------------------------------------------------------------------------
# Kernels
# --------------------------------------------------------------------------
def _whole_kernel(x_ref, w_ref, b_ref, o_ref, *, inv_n, compute_dtype, act):
    """Single-pass-over-HBM GroupNorm(1, C) for one sample (block = whole sample)."""
    xf = x_ref[...].astype(jnp.float32)                     # (1, rows, L)
    mean = jnp.sum(xf) * inv_n
    # Two-pass variance on the VMEM-resident block (no E[x^2]-mean^2 cancellation).
    var = jnp.sum(jnp.square(xf - mean)) * inv_n
    rstd = lax.rsqrt(var + _EPS)

    scale = w_ref[...] * rstd                                # (rows, 1) f32
    shift = b_ref[...] - mean * scale

    cd = jnp.dtype(compute_dtype)
    y = x_ref[...].astype(cd) * scale.astype(cd)[None] + shift.astype(cd)[None]
    if act is not None:
        y = act(y)
    o_ref[...] = y.astype(o_ref.dtype)


def _stats_kernel(x_ref, mean_ref, var_ref, s_acc, q_acc, *, inv_n):
    """Pass 1 of the tiled path: accumulate sum / sumsq over lane chunks."""
    k = pl.program_id(1)

    @pl.when(k == 0)
    def _init():
        s_acc[...] = jnp.zeros_like(s_acc)
        q_acc[...] = jnp.zeros_like(q_acc)

    x = x_ref[...].astype(jnp.float32)                       # (1, rows, Lc)
    s_acc[...] = s_acc[...] + jnp.sum(x)
    q_acc[...] = q_acc[...] + jnp.sum(x * x)

    @pl.when(k == pl.num_programs(1) - 1)
    def _finalize():
        mean = s_acc[...] * inv_n                            # (1, 1)
        var = jnp.maximum(q_acc[...] * inv_n - mean * mean, 0.0)
        mean_ref[...] = jnp.broadcast_to(mean[None], mean_ref.shape)
        var_ref[...] = jnp.broadcast_to(var[None], var_ref.shape)


def _norm_kernel(mean_ref, var_ref, w_ref, b_ref, x_ref, o_ref, *,
                 compute_dtype, act):
    """Pass 2 of the tiled path: normalize + affine one lane chunk."""
    mean = mean_ref[0, :1, :1]                               # (1, 1) f32
    var = var_ref[0, :1, :1]
    rstd = lax.rsqrt(var + _EPS)                             # vector rsqrt (EUP)

    scale = w_ref[...] * rstd                                # (rows, 1) f32
    shift = b_ref[...] - mean * scale

    cd = jnp.dtype(compute_dtype)
    y = x_ref[...].astype(cd) * scale.astype(cd)[None] + shift.astype(cd)[None]
    if act is not None:
        y = act(y)
    o_ref[...] = y.astype(o_ref.dtype)


# --------------------------------------------------------------------------
# Wrapper
# --------------------------------------------------------------------------
def prenorm_groupnorm(x_nchw, weight, bias, *, act=None,
                      force_tiled=False, max_chunk_bytes=None):
    """GroupNorm(1, C) on an NCHW tensor via Pallas TPU kernels."""
    N, C, H, W = x_nchw.shape
    HW = H * W
    inv_n = 1.0 / float(C * HW)

    rows, L, rep = _choose_layout(C, H, W)
    x3 = x_nchw.reshape(N, rows, L)          # pure (zero-copy) reshape
    w2 = jnp.repeat(weight.astype(jnp.float32).reshape(C), rep).reshape(rows, 1)
    b2 = jnp.repeat(bias.astype(jnp.float32).reshape(C), rep).reshape(rows, 1)

    in_item = jnp.dtype(x_nchw.dtype).itemsize
    out_item = in_item
    compute_dtype = _pick_compute_dtype(x_nchw.dtype)

    budget = _vmem_budget_bytes()
    slab = rows * L
    # Whole-sample path needs: 2x double-buffered input + output blocks plus
    # ~2 slab-sized f32 temps (upcast + centered square), plus slack.
    whole_need = slab * (2 * in_item + 2 * out_item + 2 * 4) + (2 << 20)

    can_tile = (L % 128 == 0) and (rows % 8 == 0)
    use_tiled = can_tile and (force_tiled or whole_need > budget)

    if not use_tiled:
        # TODO(synk): a slab that exceeds the VMEM budget *and* cannot be
        # lane-tiled (ragged layout) still runs as one whole-sample block.
        vmem_limit = int(min(budget, max(16 << 20, whole_need)))
        out = pl.pallas_call(
            functools.partial(_whole_kernel, inv_n=inv_n,
                              compute_dtype=compute_dtype, act=act),
            out_shape=jax.ShapeDtypeStruct((N, rows, L), x_nchw.dtype),
            grid_spec=pltpu.PrefetchScalarGridSpec(
                num_scalar_prefetch=0,
                grid=(N,),
                in_specs=[
                    pl.BlockSpec((1, rows, L), lambda n: (n, 0, 0)),
                    pl.BlockSpec((rows, 1), lambda n: (0, 0)),
                    pl.BlockSpec((rows, 1), lambda n: (0, 0)),
                ],
                out_specs=pl.BlockSpec((1, rows, L), lambda n: (n, 0, 0)),
            ),
            compiler_params=pltpu.CompilerParams(
                dimension_semantics=("parallel",),
                vmem_limit_bytes=vmem_limit,
            ),
            cost_estimate=pl.CostEstimate(
                flops=int(8 * N * slab),
                transcendentals=int(N),
                bytes_accessed=int(N * slab * (in_item + out_item) + 2 * rows * 4),
            ),
        )(x3, w2, b2)
        return out.reshape(N, C, H, W)

    # ---------------- tiled two-pass path (large slabs / v7x VMEM) ----------
    if max_chunk_bytes is None:
        max_chunk_bytes = max(512 * 1024, min(4 << 20, budget // 12))
    Lc = _pick_chunk_lanes(L, rows, 4, max_chunk_bytes)   # f32 working-set basis
    K = L // Lc
    chunk_f32 = rows * Lc * 4
    chunk_in = rows * Lc * in_item
    chunk_out = rows * Lc * out_item
    stat_bytes = 2 * 8 * 128 * 4

    vmem_stats = int(min(budget, max(16 << 20,
                                     2 * chunk_in + 2 * chunk_f32 + (2 << 20))))
    vmem_norm = int(min(budget, max(16 << 20, 2 * chunk_in + 2 * chunk_out
                                    + 2 * chunk_f32 + (2 << 20))))

    # Pass 1: per-sample mean/var accumulated over lane chunks.
    mean_t, var_t = pl.pallas_call(
        functools.partial(_stats_kernel, inv_n=inv_n),
        out_shape=(jax.ShapeDtypeStruct((N, 8, 128), jnp.float32),
                   jax.ShapeDtypeStruct((N, 8, 128), jnp.float32)),
        grid_spec=pltpu.PrefetchScalarGridSpec(
            num_scalar_prefetch=0,
            grid=(N, K),
            in_specs=[pl.BlockSpec((1, rows, Lc), lambda n, k: (n, 0, k))],
            out_specs=[pl.BlockSpec((1, 8, 128), lambda n, k: (n, 0, 0)),
                       pl.BlockSpec((1, 8, 128), lambda n, k: (n, 0, 0))],
            scratch_shapes=[pltpu.VMEM((1, 1), jnp.float32),
                            pltpu.VMEM((1, 1), jnp.float32)],
        ),
        compiler_params=pltpu.CompilerParams(
            dimension_semantics=("parallel", "arbitrary"),
            vmem_limit_bytes=vmem_stats,
        ),
        cost_estimate=pl.CostEstimate(
            flops=int(3 * N * slab),
            transcendentals=0,
            bytes_accessed=int(N * slab * in_item + N * stat_bytes),
        ),
    )(x3)

    # Pass 2: normalize + affine; both grid axes independent (megacore-friendly).
    out = pl.pallas_call(
        functools.partial(_norm_kernel, compute_dtype=compute_dtype, act=act),
        out_shape=jax.ShapeDtypeStruct((N, rows, L), x_nchw.dtype),
        grid_spec=pltpu.PrefetchScalarGridSpec(
            num_scalar_prefetch=0,
            grid=(N, K),
            in_specs=[
                pl.BlockSpec((1, 8, 128), lambda n, k: (n, 0, 0)),
                pl.BlockSpec((1, 8, 128), lambda n, k: (n, 0, 0)),
                pl.BlockSpec((rows, 1), lambda n, k: (0, 0)),
                pl.BlockSpec((rows, 1), lambda n, k: (0, 0)),
                pl.BlockSpec((1, rows, Lc), lambda n, k: (n, 0, k)),
            ],
            out_specs=pl.BlockSpec((1, rows, Lc), lambda n, k: (n, 0, k)),
        ),
        compiler_params=pltpu.CompilerParams(
            dimension_semantics=("parallel", "parallel"),
            vmem_limit_bytes=vmem_norm,
        ),
        cost_estimate=pl.CostEstimate(
            flops=int(2 * N * slab),
            transcendentals=int(N * K),
            bytes_accessed=int(N * slab * (in_item + out_item)
                               + N * stat_bytes + 2 * rows * 4),
        ),
    )(mean_t, var_t, w2, b2, x3)

    return out.reshape(N, C, H, W)


def prenorm_forward(x_nchw, weight, bias, fn=None, fused_elementwise=None):
    # TODO(synk): `fn` is an arbitrary injected nn.Module in the original
    # PreNorm; only an elementwise `fused_elementwise` can be fused into the
    # kernel tail, any other `fn` is applied as plain JAX afterwards.
    y = prenorm_groupnorm(x_nchw, weight, bias, act=fused_elementwise)
    return fn(y) if fn is not None else y


# --------------------------------------------------------------------------
# Pure-JAX reference + self-test
# --------------------------------------------------------------------------
def _reference(x_nchw, weight, bias):
    N, C, H, W = x_nchw.shape
    xf = x_nchw.astype(jnp.float32).reshape(N, -1)
    mean = xf.mean(axis=1, keepdims=True)
    var = ((xf - mean) ** 2).mean(axis=1, keepdims=True)
    xn = ((xf - mean) * lax.rsqrt(var + _EPS)).reshape(N, C, H, W)
    w = weight.astype(jnp.float32).reshape(1, C, 1, 1)
    b = bias.astype(jnp.float32).reshape(1, C, 1, 1)
    return xn * w + b


if __name__ == "__main__":
    key = jax.random.PRNGKey(0)
    k1, k2, k3, k4, k5 = jax.random.split(key, 5)

    # 1) Small f32, dense layout, whole-sample single-pass path.
    N, C, H, W = 2, 4, 16, 16
    x = jax.random.normal(k1, (N, C, H, W), dtype=jnp.float32)
    weight = 1.0 + 0.1 * jax.random.normal(k2, (C,), dtype=jnp.float32)
    bias = 0.1 * jax.random.normal(k3, (C,), dtype=jnp.float32)

    out = jax.block_until_ready(prenorm_forward(x, weight, bias))
    ref = _reference(x, weight, bias)
    assert out.shape == (N, C, H, W)
    assert jnp.allclose(out, ref, atol=1e-4, rtol=1e-4), (
        "whole-path mismatch, max abs diff = %e"
        % float(jnp.max(jnp.abs(out - ref))))

    # 2) Forced tiled two-pass path (stats kernel + normalize kernel, K=2 chunks).
    x2 = jax.random.normal(k4, (2, 4, 16, 32), dtype=jnp.float32)
    out2 = jax.block_until_ready(
        prenorm_groupnorm(x2, weight, bias, force_tiled=True, max_chunk_bytes=4096))
    ref2 = _reference(x2, weight, bias)
    assert jnp.allclose(out2, ref2, atol=1e-4, rtol=1e-4), (
        "tiled-path mismatch, max abs diff = %e"
        % float(jnp.max(jnp.abs(out2 - ref2))))

    # 3) bf16 input (bf16 normalize FMA on v6e/v7x, f32 path on v5e).
    xb = x.astype(jnp.bfloat16)
    outb = jax.block_until_ready(prenorm_forward(xb, weight, bias))
    refb = _reference(xb, weight, bias)
    assert jnp.allclose(outb.astype(jnp.float32), refb, atol=5e-2, rtol=5e-2), (
        "bf16 mismatch, max abs diff = %e"
        % float(jnp.max(jnp.abs(outb.astype(jnp.float32) - refb))))

    # 4) Ragged spatial size: no wrapper pad/slice, block == full array dims.
    xr = jax.random.normal(k5, (2, 3, 10, 10), dtype=jnp.float32)
    wr = 1.0 + 0.1 * jax.random.normal(k2, (3,), dtype=jnp.float32)
    br = 0.1 * jax.random.normal(k3, (3,), dtype=jnp.float32)
    outr = jax.block_until_ready(prenorm_forward(xr, wr, br))
    refr = _reference(xr, wr, br)
    assert jnp.allclose(outr, refr, atol=1e-4, rtol=1e-4), (
        "ragged-path mismatch, max abs diff = %e"
        % float(jnp.max(jnp.abs(outr - refr))))

    print("KERNEL_OK")
</pallas_src>

<mosaic_0001>
module attributes {stable_mosaic.version = 11 : i64} {
  func.func @_whole_kernel(%arg0: i32, %arg1: memref<1x8x128xf32, #tpu.memory_space<vmem>>, %arg2: memref<8x1xf32, #tpu.memory_space<vmem>>, %arg3: memref<8x1xf32, #tpu.memory_space<vmem>>, %arg4: memref<1x8x128xf32, #tpu.memory_space<vmem>>) attributes {dimension_semantics = [#tpu.dimension_semantics<parallel>], iteration_bounds = array<i64: 2>, scalar_prefetch = 0 : i64, scratch_operands = 0 : i64, tpu.core_type = #tpu.core_type<tc>, window_params = [{transform_indices = @transform_0, window_bounds = array<i64: 1, 8, 128>}, {pipeline_mode = #tpu.pipeline_mode<synchronous>, transform_indices = @transform_1, window_bounds = array<i64: 8, 1>}, {pipeline_mode = #tpu.pipeline_mode<synchronous>, transform_indices = @transform_2, window_bounds = array<i64: 8, 1>}, {transform_indices = @transform_3, window_bounds = array<i64: 1, 8, 128>}]} {
    %c0 = arith.constant 0 : index
    %c0_0 = arith.constant 0 : index
    %c0_1 = arith.constant 0 : index
    %0 = vector.load %arg1[%c0, %c0_0, %c0_1] : memref<1x8x128xf32, #tpu.memory_space<vmem>>, vector<1x8x128xf32>
    %1 = vector.shape_cast %0 : vector<1x8x128xf32> to vector<1x1x8x128xf32>
    %cst = arith.constant dense<0.000000e+00> : vector<1xf32>
    %2 = vector.multi_reduction <add>, %1, %cst [1, 2, 3] : vector<1x1x8x128xf32> to vector<1xf32>
    %3 = vector.shape_cast %2 : vector<1xf32> to vector<1x1x1x1xf32>
    %4 = vector.extract %3[0, 0, 0, 0] : f32 from vector<1x1x1x1xf32>
    %cst_2 = arith.constant 9.765625E-4 : f32
    %5 = arith.mulf %4, %cst_2 : f32
    %6 = vector.broadcast %5 : f32 to vector<1x8x128xf32>
    %7 = arith.subf %0, %6 : vector<1x8x128xf32>
    %8 = arith.mulf %7, %7 : vector<1x8x128xf32>
    %9 = vector.shape_cast %8 : vector<1x8x128xf32> to vector<1x1x8x128xf32>
    %cst_3 = arith.constant dense<0.000000e+00> : vector<1xf32>
    %10 = vector.multi_reduction <add>, %9, %cst_3 [1, 2, 3] : vector<1x1x8x128xf32> to vector<1xf32>
    %11 = vector.shape_cast %10 : vector<1xf32> to vector<1x1x1x1xf32>
    %12 = vector.extract %11[0, 0, 0, 0] : f32 from vector<1x1x1x1xf32>
    %cst_4 = arith.constant 9.765625E-4 : f32
    %13 = arith.mulf %12, %cst_4 : f32
    %cst_5 = arith.constant 9.99999974E-6 : f32
    %14 = arith.addf %13, %cst_5 : f32
    %15 = math.rsqrt %14 : f32
    %c0_6 = arith.constant 0 : index
    %c0_7 = arith.constant 0 : index
    %16 = vector.load %arg2[%c0_6, %c0_7] : memref<8x1xf32, #tpu.memory_space<vmem>>, vector<8x1xf32>
    %17 = vector.broadcast %15 : f32 to vector<8x1xf32>
    %18 = arith.mulf %16, %17 : vector<8x1xf32>
    %c0_8 = arith.constant 0 : index
    %c0_9 = arith.constant 0 : index
    %19 = vector.load %arg3[%c0_8, %c0_9] : memref<8x1xf32, #tpu.memory_space<vmem>>, vector<8x1xf32>
    %20 = vector.broadcast %5 : f32 to vector<8x1xf32>
    %21 = arith.mulf %20, %18 : vector<8x1xf32>
    %22 = arith.subf %19, %21 : vector<8x1xf32>
    %c0_10 = arith.constant 0 : index
    %c0_11 = arith.constant 0 : index
    %c0_12 = arith.constant 0 : index
    %23 = vector.load %arg1[%c0_10, %c0_11, %c0_12] : memref<1x8x128xf32, #tpu.memory_space<vmem>>, vector<1x8x128xf32>
    %24 = vector.shape_cast %18 : vector<8x1xf32> to vector<1x8x1xf32>
    %25 = vector.broadcast %24 : vector<1x8x1xf32> to vector<1x8x128xf32>
    %26 = arith.mulf %23, %25 : vector<1x8x128xf32>
    %27 = vector.shape_cast %22 : vector<8x1xf32> to vector<1x8x1xf32>
    %28 = vector.broadcast %27 : vector<1x8x1xf32> to vector<1x8x128xf32>
    %29 = arith.addf %26, %28 : vector<1x8x128xf32>
    %c0_13 = arith.constant 0 : index
    %c0_14 = arith.constant 0 : index
    %c0_15 = arith.constant 0 : index
    %30 = vector.load %arg4[%c0_13, %c0_14, %c0_15] : memref<1x8x128xf32, #tpu.memory_space<vmem>>, vector<1x8x128xf32>
    tpu.vector_store %arg4[%c0_13, %c0_14, %c0_15], %29 {strides = array<i32>} : memref<1x8x128xf32, #tpu.memory_space<vmem>>, vector<1x8x128xf32>,
    return
  }
  func.func @transform_0(%arg0: i32) -> (i32, i32, i32) {
    %c0_i32 = arith.constant 0 : i32
    %c0_i32_0 = arith.constant 0 : i32
    %c0_i32_1 = arith.constant 0 : i32
    return %arg0, %c0_i32, %c0_i32_0 : i32, i32, i32
  }
  func.func @transform_1(%arg0: i32) -> (i32, i32) {
    %c0_i32 = arith.constant 0 : i32
    %c0_i32_0 = arith.constant 0 : i32
    %c0_i32_1 = arith.constant 0 : i32
    return %c0_i32, %c0_i32_0 : i32, i32
  }
  func.func @transform_2(%arg0: i32) -> (i32, i32) {
    %c0_i32 = arith.constant 0 : i32
    %c0_i32_0 = arith.constant 0 : i32
    %c0_i32_1 = arith.constant 0 : i32
    return %c0_i32, %c0_i32_0 : i32, i32
  }
  func.func @transform_3(%arg0: i32) -> (i32, i32, i32) {
    %c0_i32 = arith.constant 0 : i32
    %c0_i32_0 = arith.constant 0 : i32
    %c0_i32_1 = arith.constant 0 : i32
    return %arg0, %c0_i32, %c0_i32_0 : i32, i32, i32
  }
}

</mosaic_0001>

<bundles_post_ra>
// kernel: tpu_custom_call.1
= control target key start
LH: loop header
LB: loop body
LE: loop exit
PB: predicated region body
PF: predicated region fallthrough
CT: control target
= control target key end

     0   :  { %8 = vsyncpa [#allocation3], 0  ;;  %s538_s0 = inlined_call_operand.vmem [shape: f32[2,8,128], index: 0, kind: input, shape index: {}]   ;;  %s539_s1 = inlined_call_operand.vmem [shape: f32[8,1], index: 1, kind: input, shape index: {}]   ;;  %s540_s2 = inlined_call_operand.vmem [shape: f32[8,1], index: 2, kind: input, shape index: {}]   ;;  %s541_s3 = inlined_call_operand.hbm [shape: f32[2,8,128], index: 3, kind: output, shape index: {}]  }
   0x1   :  { %10 = vsyncpa [#allocation3 + $0x1], 0  ;;  %s432_s12 = smov 0   ;;  %s434_s13 = smov 0  }
   0x2   :  { %s436_s14 = smov 0   ;;  %s438_s15 = smov 0  }
   0x3 LB: > { %s453_s16 = sadd.s32 4294967295, %s408_s15   ;;  %s286_s17 = sadd.s32 4294967294, %s408_s15   ;;  %s408_s15 = sphi %s438_s15, %s547_s15   ;;  %s404_s14 = sphi %s436_s14, %s546_s14   ;;  %s400_s13 = sphi %s434_s13, %s545_s13   ;;  %s396_s12 = sphi %s432_s12, %s544_s12  }
   0x4   : > { %s457_s18 = sadd.s32 1, %s408_s15   ;;  %s91_s19 = sadd.s32 1, %s404_s14 }
   0x5   : > { %s88_s20 = ssub.s32 %s408_s15, %s457_s18  ;;  %p101_p0 = scmp.ne.s32.totalorder %s404_s14, %s400_s13 }
   0x6   : > { %p89_p1 = scmp.eq.s32.totalorder %s88_s20, 0  ;;  %p102_p2 = scmp.eq.s32.totalorder %s453_s16, 1 }
   0x7   : > { %p107_p3 = scmp.ne.s32.totalorder %s400_s13, %s396_s12  ;;  %p108_p4 = scmp.eq.s32.totalorder %s286_s17, 1 }
   0x8   : > { %s468_s21 = scalar_select %p89_p1, %s404_s14, %s91_s19  }
   0x9   : > { %p470_p5 = por %p102_p2, %p101_p0  ;;  %p474_p6 = por %p108_p4, %p107_p3 }
   0xa   : > { %p289_p7 = scmp.ge.s32.totalorder %s408_s15, 1  ;;  %p139_p8 = scmp.lt.s32.totalorder %s408_s15, 3 }
   0xc   : > { %p140_p9 = pnand %p289_p7, %p139_p8 }
   0xd   : > { %p162_p10 = scmp.lt.s32.totalorder (!%p140_p9), %s453_s16, 1  ;;  %v410_v14 = vmov (!%p140_p9), 0   ;;  %v194_v21 = vld [vmem:[%s539_s1] sm:$0xff] (!%p140_p9)  ;;  %s159_s17 = sand.u32 (!%p140_p9), 1, %s400_s13  }
   0xe   : > { %143 = sbr.rel (%p140_p9) target bundleno = 658 (0x292), region = 32  ;;  %342 = vset.pattern.permute.xlu1 (!%p140_p9), %v410_v14  ;;  %343 = vset.pattern.permute.xlu0 (!%p140_p9), %v410_v14  ;;  %v197_v24 = vld [vmem:[%s540_s2] sm:$0xff] (!%p140_p9)  ;;  %s290_s19 = sshll.u32 (!%p140_p9), %s159_s17, 3 }
   0xf   : > { %s293_s20 = sshll.u32 (!%p140_p9), %s453_s16, 7 }
  0x15   : > { %s163_s24 = scalar_select %p162_p10, %s453_s16, 1 }
  0x16   : > { %s411_s16 = smov [#allocation2]  }
  0x17   : > { %s291_s25 = sshll.u32 %s163_s24, 3  ;;  %s161_s24 = scalar_lea.vmem [#allocation2], %s290_s19 }
  0x18   : > { %s165_s28 = scalar_lea.vmem %s538_s0, %s291_s25  ;;  %s227_s25 = sshll.u32 %s161_s24, 4  ;;  %s498_s25 = int_to_ptr.vmem [resolvable:$true] %s227_s25 }
  0x19   : > { %v166_v0 = vld [vmem:[%s165_s28] sm:$0xff]  ;;  %s496_s28 = scalar_lea.hbm %s541_s3, %s293_s20 }
  0x1a   : > { %167 = vadd.xlane.f32.xlu0 %v166_v0 }
  0xa7   : > { %v168_v1 = vpop.xlane.xlu0 %167 }
  0xa8   : > { %v169_v2 = vrot.slane %v168_v1, 4 }
  0xaa   : > { %v170_v3 = vadd.f32 %v169_v2, %v168_v1 }
  0xac   : > { %v171_v4 = vrot.slane %v170_v3, 2 }
  0xae   : > { %v172_v5 = vadd.f32 %v171_v4, %v170_v3 }
  0xb0   : > { %v173_v6 = vrot.slane %v172_v5, 1 }
  0xb2   : > { %v174_v7 = vadd.f32 %v173_v6, %v172_v5 }
  0xb4   : > { %296 = vpush %v174_v7 }
  0xe5   : > { %s297_s29 = spop %296 }
  0xe6   : > { %s176_s30 = smul.f32 0.0009765625, %s297_s29  ;;  %s214_s29 = scalar_lea.sflag [#allocation3], %s159_s17 }
  0xe8   : > { %v177_v8 = vstv %s176_s30  ;;  %s346_s30 = scalar_lea.vmem %s498_s25, 128 }
  0xe9   : > { %v178_v9 = vsub.f32 %v166_v0, %v177_v8  ;;  %p347_p11 = scmp.ne.s32.totalorder %s498_s25, %s346_s30 }
  0xeb   : > { %v179_v10 = vmul.f32 %v178_v9, %v178_v9  ;;  %p348_p12 = pnand %p347_p11, %p470_p5 }
  0xed   : > { %180 = vadd.xlane.f32.xlu0 %v179_v10  ;;  %p349_p13 = pneg %p348_p12 }
 0x17a   : > { %v181_v11 = vpop.xlane.xlu0 %180 }
 0x17b   : > { %v182_v12 = vrot.slane %v181_v11, 4 }
 0x17d   : > { %v183_v13 = vadd.f32 %v182_v12, %v181_v11 }
 0x17f   : > { %v184_v15 = vrot.slane %v183_v13, 2 }
 0x181   : > { %v185_v16 = vadd.f32 %v184_v15, %v183_v13 }
 0x183   : > { %v186_v17 = vrot.slane %v185_v16, 1 }
 0x185   : > { %v187_v18 = vadd.f32 %v186_v17, %v185_v16 }
 0x187   : > { %298 = vpush %v187_v18 }
 0x1b8   : > { %s299_s4 = spop %298 }
 0x1b9   : > { %s189_s5 = smul.f32 0.0009765625, %s299_s4  ;;  %s350_s4 = sshll.u32 %s411_s16, 4  ;;  %s351_s4 = int_to_ptr.vmem [resolvable:$false] %s350_s4 }
 0x1ba   : > { %p353_p0 = scmp.lt.s32.totalorder %s498_s25, %s351_s4 }
 0x1bb   : > { %s190_s6 = sadd.f32 1e-05, %s189_s5  ;;  %s352_s5 = scalar_lea.vmem %s351_s4, 256 }
 0x1bc   : > { %p354_p1 = scmp.lt.s32.totalorder %s352_s5, %s346_s30 }
 0x1bd   : > { %v191_v19 = vstv %s190_s6 }
 0x1be   : > { %344 = vrsqrt.f32 %v191_v19  ;;  %p355_p2 = por %p354_p1, %p353_p0 }
 0x1c0   : > { %p356_p3 = pnand %p355_p2, %p349_p13 }
 0x1c8   : > { %v345_v20 = vpop.eup %344 }
 0x1c9   : > { %300 = vpush %v345_v20 }
 0x1fa   : > { %s301_s9 = spop %300 }
 0x1fb   : > { %v195_v22 = vstv %s301_s9 }
 0x1fc   : > { %v196_v23 = vmul.f32 %v195_v22, %v194_v21 }
 0x1fe   : > { %v198_v25 = vmul.f32 %v196_v23, %v177_v8  ;;  %202 = vperm.xlu1 %342, %v196_v23  }
 0x200   : > { %v199_v26 = vsub.f32 %v197_v24, %v198_v25 }
 0x202   : > { %208 = vperm.xlu1 %342, %v199_v26  }
 0x27d   : > { %v203_v27 = vpop.permute.xlu1 %202 }
 0x27e   : > { %v205_v28 = vmul.f32 %v203_v27, %v166_v0 }
 0x281   : > { %v209_v29 = vpop.permute.xlu1 %208 }
 0x282   : > { %v211_v30 = vadd.f32 %v209_v29, %v205_v28 }
 0x284   : > { %212 = vst [vmem:[%s161_s24] sm:$0xff] %v211_v30 }
 0x285   : > { %359 = shalt.err (!%p356_p3)
}
 0x286   : > { %s360_s6 = scalar_lea.hbm %s496_s28, 128  ;;  %s364_s9 = scalar_lea.hbm %s541_s3, 256 }
 0x287   : > { %p361_p4 = scmp.ne.s32.totalorder %s496_s28, %s360_s6  ;;  %p365_p9 = scmp.lt.u32.totalorder %s496_s28, %s541_s3 }
 0x288   : > { %p366_p10 = scmp.lt.u32.totalorder %s364_s9, %s360_s6  ;;  %p368_p12 = scmp.lt.u32.totalorder %s360_s6, %s496_s28 }
 0x289   : > { %p362_p7 = pnand %p361_p4, %p470_p5 }
 0x28a   : > { %p367_p11 = por %p366_p10, %p365_p9 }
 0x28b   : > { %p363_p8 = pneg %p362_p7 }
 0x28c   : > { %p369_p13 = por %p368_p12, %p367_p11 }
 0x28e   : > { %p370_p0 = pnand %p369_p13, %p363_p8 }
 0x290   : > { %373 = shalt.err (!%p370_p0)
}
 0x291   : > { %302 = dma.vmem_to_hbm [thread:$0]  (%p470_p5), %s498_s25, 128, %s496_s28, %s214_s29  }
 0x292 PF: > { %p308_p1 = scmp.ge.s32.totalorder %s408_s15, 2  ;;  %s239_s17 = sand.u32 1, %s396_s12  }
 0x293   : > { %s240_s19 = scalar_lea.sflag [#allocation3], %s239_s17 }
 0x294   : > { %p305_p2 = pnand %p308_p1, %p474_p6 }
 0x296   : > { %391 = dma.done.wait (!%p305_p2), %s240_s19, 128  }
 0x297   : > { %393 = vsyncadd (!%p305_p2), %s240_s19, 4294967168  ;;  %p13_p3 = scmp.ge.s32.totalorder %s457_s18, 4   ;;  %s544_s12 = smov %s400_s13 }
 0x298   : > { %s545_s13 = smov %s404_s14  ;;  %s546_s14 = smov %s468_s21 }
 0x299   : > { %s547_s15 = smov %s457_s18  ;;  %15 = sbr.rel (!%p13_p3) target bundleno = 3 (0x3), region = 67 }
 0x2a0   :  { %245 = vsyncpa [#allocation3], 1 }
 0x2a1   :  { %247 = vsyncpa [#allocation3 + $0x1], 1 }

</bundles_post_ra>
